<compile_context>
chip_gen: v6e
topology: v6e:2x2x1
jax: 0.10.0
libtpu: 0.0.40
codegen_flags: <defaults>
</compile_context>

<pallas_src>
import functools

import jax
import jax.numpy as jnp
from jax.experimental import pallas as pl
from jax.experimental.pallas import tpu as pltpu


# ----------------------------- Pallas kernels ------------------------------

def _maxpool_kernel(x_ref, o_ref, *, C):
    # x_ref: (ho, 2, wo, 2*C) -- row pairs on dim 1, column pairs folded into lanes.
    x = x_ref[...]
    rmax = jnp.maximum(x[:, 0], x[:, 1])                        # vertical max  (ho, wo, 2C)
    o_ref[...] = jnp.maximum(rmax[:, :, :C], rmax[:, :, C:])    # horizontal max (ho, wo, C)


def maxpool2x2(x_nhwc):
    """2x2 max pool, stride 2.  One contiguous read per batch element; pooling in VMEM."""
    n, h, w, c = x_nhwc.shape
    ho, wo = h // 2, w // 2
    xr = x_nhwc.reshape(n * ho, 2, wo, 2 * c)                   # free row-major regrouping
    out = pl.pallas_call(
        functools.partial(_maxpool_kernel, C=c),
        out_shape=jax.ShapeDtypeStruct((n * ho, wo, c), x_nhwc.dtype),
        grid=(n,),
        in_specs=[pl.BlockSpec((ho, 2, wo, 2 * c), lambda i: (i, 0, 0, 0))],
        out_specs=pl.BlockSpec((ho, wo, c), lambda i: (i, 0, 0)),
        compiler_params=pltpu.CompilerParams(dimension_semantics=("parallel",)),
    )(xr)
    return out.reshape(n, ho, wo, c)


def _conv3x3_kernel(x_ref, w_ref, b_ref, o_ref, *rest,
                    H, W, Cin, Cout, relu, with_stats):
    if with_stats:
        sum_ref, sq_ref, xp_ref, pat_ref = rest
    else:
        xp_ref, pat_ref = rest

    # SAME padding directly in VMEM (no HBM-side jnp.pad copy).
    xp_ref[...] = jnp.zeros_like(xp_ref)
    xp_ref[1:H + 1, 1:W + 1, :] = x_ref[0]

    # im2col: lane-stack the 9 shifted taps into a (H, W, 9*Cin) scratch.
    for dy in range(3):
        for dx in range(3):
            t = dy * 3 + dx
            pat_ref[:, :, t * Cin:(t + 1) * Cin] = xp_ref[dy:dy + H, dx:dx + W, :]

    # Single bf16 MXU matmul with fp32 accumulation (K = 9*Cin).
    patches = pat_ref[...].reshape(H * W, 9 * Cin).astype(jnp.bfloat16)
    acc = jnp.dot(patches, w_ref[...], preferred_element_type=jnp.float32)
    acc = acc + b_ref[...]                                      # (1, Cout) broadcast

    if with_stats:
        # Fused BatchNorm batch statistics of the pre-activation conv output.
        @pl.when(pl.program_id(0) == 0)
        def _():
            sum_ref[...] = jnp.zeros_like(sum_ref)
            sq_ref[...] = jnp.zeros_like(sq_ref)
        sum_ref[...] += jnp.sum(acc, axis=0, keepdims=True)
        sq_ref[...] += jnp.sum(acc * acc, axis=0, keepdims=True)

    if relu:
        acc = jnp.maximum(acc, 0.0)
    o_ref[...] = acc.reshape(1, H, W, Cout).astype(o_ref.dtype)


def conv3x3_same(x_nhwc, w_hwio, bias=None, *, relu=False, with_stats=False):
    """3x3 conv, padding=1, stride=1.  One im2col MXU matmul per batch element."""
    n, h, w, cin = x_nhwc.shape
    cout = w_hwio.shape[-1]
    wmat = w_hwio.astype(jnp.bfloat16).reshape(9 * cin, cout)   # (dy, dx, ci) tap order
    if bias is None:
        bias = jnp.zeros((cout,), jnp.float32)
    bias2d = bias.reshape(1, cout).astype(jnp.float32)

    out_shape = [jax.ShapeDtypeStruct((n, h, w, cout), jnp.float32)]
    out_specs = [pl.BlockSpec((1, h, w, cout), lambda i: (i, 0, 0, 0))]
    if with_stats:
        out_shape += [jax.ShapeDtypeStruct((1, cout), jnp.float32)] * 2
        out_specs += [pl.BlockSpec((1, cout), lambda i: (0, 0))] * 2   # accumulators

    kern = functools.partial(_conv3x3_kernel, H=h, W=w, Cin=cin, Cout=cout,
                             relu=relu, with_stats=with_stats)
    res = pl.pallas_call(
        kern,
        out_shape=tuple(out_shape),
        grid=(n,),
        in_specs=[
            pl.BlockSpec((1, h, w, cin), lambda i: (i, 0, 0, 0)),
            pl.BlockSpec((9 * cin, cout), lambda i: (0, 0)),
            pl.BlockSpec((1, cout), lambda i: (0, 0)),
        ],
        out_specs=tuple(out_specs),
        scratch_shapes=[
            pltpu.VMEM((h + 2, w + 2, cin), jnp.float32),       # padded input tile
            pltpu.VMEM((h, w, 9 * cin), jnp.float32),           # im2col patch matrix
        ],
        compiler_params=pltpu.CompilerParams(
            # stats outputs accumulate across the batch axis -> "arbitrary"
            dimension_semantics=("arbitrary",) if with_stats else ("parallel",),
            vmem_limit_bytes=48 * 1024 * 1024),
    )(x_nhwc, wmat, bias2d)
    return res if with_stats else res[0]


def _spade_apply_kernel(x_ref, gb_ref, m_ref, s_ref, o_ref, *, C):
    # out = relu( (x - mean) * invstd * (1 + gamma) + beta ),  gb = gamma|beta on lanes
    xn = (x_ref[...] - m_ref[...]) * s_ref[...]
    gb = gb_ref[...]
    gamma = gb[:, :, :, :C]
    beta = gb[:, :, :, C:]
    o_ref[...] = jnp.maximum(xn * (1.0 + gamma) + beta, 0.0)


def spade_apply_relu(x, gb, mean, invstd):
    n, h, w, c = x.shape
    blk = pl.BlockSpec((1, h, w, c), lambda i: (i, 0, 0, 0))
    gblk = pl.BlockSpec((1, h, w, 2 * c), lambda i: (i, 0, 0, 0))
    sblk = pl.BlockSpec((1, 1, 1, c), lambda i: (0, 0, 0, 0))
    return pl.pallas_call(
        functools.partial(_spade_apply_kernel, C=c),
        out_shape=jax.ShapeDtypeStruct((n, h, w, c), jnp.float32),
        grid=(n,),
        in_specs=[blk, gblk, sblk, sblk],
        out_specs=blk,
        compiler_params=pltpu.CompilerParams(dimension_semantics=("parallel",)),
    )(x, gb, mean.reshape(1, 1, 1, c), invstd.reshape(1, 1, 1, c))


# ----------------------------- model forward --------------------------------

def _nearest_resize(seg, h2, w2):
    # glue: nearest-neighbor resize of segmap to the pooled spatial size
    hs, ws = seg.shape[1], seg.shape[2]
    ri = (jnp.arange(h2) * hs) // h2
    ci = (jnp.arange(w2) * ws) // w2
    return seg[:, ri][:, :, ci]


def _spade_relu(x, stats, segr, p):
    # BatchNorm2d(affine=False), training mode, from the fused in-kernel statistics.
    n, h, w, c = x.shape
    cnt = float(n * h * w)
    s, sq = stats
    mean = s.reshape(-1) / cnt
    var = jnp.maximum(sq.reshape(-1) / cnt - mean * mean, 0.0)   # biased variance
    invstd = jax.lax.rsqrt(var + 1e-5)
    actv = conv3x3_same(segr, p["ws"], p["bs"], relu=True)       # mlp_shared + ReLU
    wgb = jnp.concatenate([p["wg"], p["wb"]], axis=-1)           # fuse gamma|beta convs
    bgb = jnp.concatenate([p["bg"], p["bb"]], axis=0)
    gb = conv3x3_same(actv, wgb, bgb, relu=False)                # (N,H,W,2*norm_nc)
    return spade_apply_relu(x, gb, mean, invstd)                 # SPADE apply + fused ReLU


def down_plus_tissue(x_nchw, seg_nchw, params):
    x = jnp.transpose(x_nchw, (0, 2, 3, 1)).astype(jnp.float32)    # NCHW -> NHWC
    seg = jnp.transpose(seg_nchw, (0, 2, 3, 1)).astype(jnp.float32)

    xp = maxpool2x2(x)                                             # MaxPool2d(2)
    segr = _nearest_resize(seg, xp.shape[1], xp.shape[2])

    h1, s1, q1 = conv3x3_same(xp, params["conv1_w"], with_stats=True)   # conv1 (no bias)
    h1 = _spade_relu(h1, (s1, q1), segr, params["spade1"])               # bn1 + relu1
    h2, s2, q2 = conv3x3_same(h1, params["conv2_w"], with_stats=True)    # conv2 (no bias)
    out = _spade_relu(h2, (s2, q2), segr, params["spade2"])              # bn2 + relu2
    return jnp.transpose(out, (0, 3, 1, 2))                              # NHWC -> NCHW


# ------------------------ reference (plain JAX) path -------------------------

def _ref_conv(x, w, bias=None, relu=False):
    out = jax.lax.conv_general_dilated(
        x.astype(jnp.bfloat16), w.astype(jnp.bfloat16),
        window_strides=(1, 1), padding="SAME",
        dimension_numbers=("NHWC", "HWIO", "NHWC"),
        preferred_element_type=jnp.float32)
    if bias is not None:
        out = out + bias.reshape(1, 1, 1, -1)
    if relu:
        out = jnp.maximum(out, 0.0)
    return out


def ref_down_plus_tissue(x_nchw, seg_nchw, params):
    x = jnp.transpose(x_nchw, (0, 2, 3, 1)).astype(jnp.float32)
    seg = jnp.transpose(seg_nchw, (0, 2, 3, 1)).astype(jnp.float32)
    n, h, w, c = x.shape
    xp = jnp.max(x.reshape(n, h // 2, 2, w // 2, 2, c), axis=(2, 4))
    segr = _nearest_resize(seg, xp.shape[1], xp.shape[2])

    def spade(xx, p):
        mean = jnp.mean(xx, axis=(0, 1, 2))
        var = jnp.mean(jnp.square(xx - mean.reshape(1, 1, 1, -1)), axis=(0, 1, 2))
        invstd = jax.lax.rsqrt(var + 1e-5)
        actv = _ref_conv(segr, p["ws"], p["bs"], relu=True)
        gamma = _ref_conv(actv, p["wg"], p["bg"])
        beta = _ref_conv(actv, p["wb"], p["bb"])
        xn = (xx - mean.reshape(1, 1, 1, -1)) * invstd.reshape(1, 1, 1, -1)
        return jnp.maximum(xn * (1.0 + gamma) + beta, 0.0)

    h1 = _ref_conv(xp, params["conv1_w"])
    h1 = spade(h1, params["spade1"])
    h2 = _ref_conv(h1, params["conv2_w"])
    h2 = spade(h2, params["spade2"])
    return jnp.transpose(h2, (0, 3, 1, 2))


# ----------------------------- parameter init --------------------------------

def make_params(key, in_ch, out_ch, nhidden=128, label_nc=3):
    mid = out_ch
    ks = jax.random.split(key, 4)

    def w(k, cin, cout):  # HWIO
        return 0.1 * jax.random.normal(k, (3, 3, cin, cout), jnp.float32)

    def spade_p(k, norm_nc):
        k1, k2, k3, k4, k5, k6 = jax.random.split(k, 6)
        return {
            "ws": w(k1, label_nc, nhidden), "bs": 0.1 * jax.random.normal(k2, (nhidden,)),
            "wg": w(k3, nhidden, norm_nc), "bg": 0.1 * jax.random.normal(k4, (norm_nc,)),
            "wb": w(k5, nhidden, norm_nc), "bb": 0.1 * jax.random.normal(k6, (norm_nc,)),
        }

    return {
        "conv1_w": w(ks[0], in_ch, mid),
        "spade1": spade_p(ks[1], mid),
        "conv2_w": w(ks[2], mid, out_ch),
        "spade2": spade_p(ks[3], out_ch),
    }


# ---------------------------------- main -------------------------------------

if __name__ == "__main__":
    key = jax.random.PRNGKey(0)
    kx, kseg, kp = jax.random.split(key, 3)

    N, Cin, Cout, H, W = 2, 4, 8, 16, 16
    x = jax.random.normal(kx, (N, Cin, H, W), jnp.float32)        # NCHW like PyTorch
    segmap = jax.random.normal(kseg, (N, 3, H, W), jnp.float32)   # label_nc = 3

    params = make_params(kp, Cin, Cout)

    out = down_plus_tissue(x, segmap, params)
    out = jax.block_until_ready(out)
    assert out.shape == (N, Cout, H // 2, W // 2), out.shape

    # pure-JAX reference of the same forward pass (same bf16 matmul operands)
    ref = ref_down_plus_tissue(x, segmap, params)
    ref = jax.block_until_ready(ref)
    err = float(jnp.max(jnp.abs(out - ref)))
    assert jnp.allclose(out, ref, atol=3e-2, rtol=3e-2), err

    print("KERNEL_OK")
</pallas_src>

<mosaic_0001>
module attributes {stable_mosaic.version = 11 : i64} {
  func.func @_maxpool_kernel(%arg0: i32, %arg1: memref<8x2x8x8xf32, #tpu.memory_space<vmem>>, %arg2: memref<8x8x4xf32, #tpu.memory_space<vmem>>) attributes {dimension_semantics = [#tpu.dimension_semantics<parallel>], iteration_bounds = array<i64: 2>, scalar_prefetch = 0 : i64, scratch_operands = 0 : i64, tpu.core_type = #tpu.core_type<tc>, window_params = [{transform_indices = @transform_0, window_bounds = array<i64: 8, 2, 8, 8>}, {transform_indices = @transform_1, window_bounds = array<i64: 8, 8, 4>}]} {
    %c0 = arith.constant 0 : index
    %c0_0 = arith.constant 0 : index
    %c0_1 = arith.constant 0 : index
    %c0_2 = arith.constant 0 : index
    %0 = vector.load %arg1[%c0, %c0_0, %c0_1, %c0_2] : memref<8x2x8x8xf32, #tpu.memory_space<vmem>>, vector<8x2x8x8xf32>
    %1 = vector.extract_strided_slice %0 {offsets = [0, 0, 0, 0], sizes = [8, 1, 8, 8], strides = [1, 1, 1, 1]} : vector<8x2x8x8xf32> to vector<8x1x8x8xf32>
    %2 = vector.shape_cast %1 : vector<8x1x8x8xf32> to vector<8x8x8xf32>
    %3 = vector.extract_strided_slice %0 {offsets = [0, 1, 0, 0], sizes = [8, 1, 8, 8], strides = [1, 1, 1, 1]} : vector<8x2x8x8xf32> to vector<8x1x8x8xf32>
    %4 = vector.shape_cast %3 : vector<8x1x8x8xf32> to vector<8x8x8xf32>
    %5 = arith.maximumf %2, %4 : vector<8x8x8xf32>
    %6 = vector.extract_strided_slice %5 {offsets = [0, 0, 0], sizes = [8, 8, 4], strides = [1, 1, 1]} : vector<8x8x8xf32> to vector<8x8x4xf32>
    %7 = vector.extract_strided_slice %5 {offsets = [0, 0, 4], sizes = [8, 8, 4], strides = [1, 1, 1]} : vector<8x8x8xf32> to vector<8x8x4xf32>
    %8 = arith.maximumf %6, %7 : vector<8x8x4xf32>
    %c0_3 = arith.constant 0 : index
    %c0_4 = arith.constant 0 : index
    %c0_5 = arith.constant 0 : index
    %9 = vector.load %arg2[%c0_3, %c0_4, %c0_5] : memref<8x8x4xf32, #tpu.memory_space<vmem>>, vector<8x8x4xf32>
    tpu.vector_store %arg2[%c0_3, %c0_4, %c0_5], %8 {strides = array<i32>} : memref<8x8x4xf32, #tpu.memory_space<vmem>>, vector<8x8x4xf32>,
    return
  }
  func.func @transform_0(%arg0: i32) -> (i32, i32, i32, i32) {
    %c0_i32 = arith.constant 0 : i32
    %c0_i32_0 = arith.constant 0 : i32
    %c0_i32_1 = arith.constant 0 : i32
    %c0_i32_2 = arith.constant 0 : i32
    return %arg0, %c0_i32, %c0_i32_0, %c0_i32_1 : i32, i32, i32, i32
  }
  func.func @transform_1(%arg0: i32) -> (i32, i32, i32) {
    %c0_i32 = arith.constant 0 : i32
    %c0_i32_0 = arith.constant 0 : i32
    %c0_i32_1 = arith.constant 0 : i32
    return %arg0, %c0_i32, %c0_i32_0 : i32, i32, i32
  }
}

</mosaic_0001>

<bundles_post_ra>
// kernel: tpu_custom_call.1
= control target key start
LH: loop header
LB: loop body
LE: loop exit
PB: predicated region body
PF: predicated region fallthrough
CT: control target
= control target key end

     0   :  { %s293_s6 = smov 0   ;;  %s322_s0 = inlined_call_operand.vmem [shape: f32[16,2,8,8], index: 0, kind: input, shape index: {}]   ;;  %s323_s1 = inlined_call_operand.vmem [shape: f32[16,8,4], index: 1, kind: output, shape index: {}]  }
   0x1 LB: > { %s252_s7 = sadd.s32 4294967295, %s280_s6   ;;  %p256_p0 = scmp.ge.s32.totalorder %s280_s6, 1  ;;  %s280_s6 = sphi %s293_s6, %s11_s6  }
   0x2   : > { %p89_p1 = scmp.lt.s32.totalorder %s280_s6, 3 }
   0x4   : > { %p90_p2 = pnand %p256_p0, %p89_p1 }
   0x5   : > { %s257_s8 = sshll.u32 (!%p90_p2), %s252_s7, 3  ;;  %s282_s13 = smov (!%p90_p2), 124  }
   0x6   : > { %93 = sbr.rel (%p90_p2) target bundleno = 148 (0x94), region = 24  ;;  %p111_p3 = scmp.lt.s32.totalorder (!%p90_p2), %s257_s8, 15 }
   0xb   : > { %s325_s8 = smov (!%p111_p3, %s257_s8), 15  ;;  %vm187_vm0 = vcmask 31744  }
   0xc   : > { %s264_s9 = sshll.u32 %s325_s8, 4  ;;  %s261_s14 = sshll.u32 %s325_s8, 3 }
   0xd   : > { %s115_s12 = scalar_lea.vmem %s322_s0, %s264_s9  ;;  %s121_s17 = scalar_lea.vmem %s323_s1, %s261_s14 }
   0xe   : > { %v127_v0 = vld [vmem:[%s115_s12 + $0x20] sm:$0xff]  ;;  %v128_v1 = vld [vmem:[%s115_s12 + $0x28] sm:$0xff]  ;;  %v129_v5 = vld [vmem:[%s115_s12 + $0x30] sm:$0xff] }
   0xf   : > { %v123_v2 = vld [vmem:[%s115_s12] sm:$0xff]  ;;  %v141_v3 = vmax.f32 %v127_v0, %v128_v1  ;;  %v124_v4 = vld [vmem:[%s115_s12 + $0x8] sm:$0xff]  ;;  %v130_v6 = vld [vmem:[%s115_s12 + $0x38] sm:$0xff] }
  0x10   : > { %v139_v7 = vmax.f32 %v123_v2, %v124_v4  ;;  %v125_v8 = vld [vmem:[%s115_s12 + $0x10] sm:$0xff]  ;;  %v126_v9 = vld [vmem:[%s115_s12 + $0x18] sm:$0xff]  ;;  %v142_v10 = vmax.f32 %v129_v5, %v130_v6  ;;  %v131_v14 = vld [vmem:[%s115_s12 + $0x40] sm:$0xff] }
  0x11   : > { %159 = vrot.lane.b32.xlu1 %v141_v3, %s282_s13  ;;  %v140_v11 = vmax.f32 %v125_v8, %v126_v9  ;;  %v133_v12 = vld [vmem:[%s115_s12 + $0x50] sm:$0xff]  ;;  %v134_v13 = vld [vmem:[%s115_s12 + $0x58] sm:$0xff]  ;;  %v132_v15 = vld [vmem:[%s115_s12 + $0x48] sm:$0xff] }
  0x12   : > { %155 = vrot.lane.b32.xlu0 %v139_v7, %s282_s13  ;;  %v144_v16 = vmax.f32 %v133_v12, %v134_v13  ;;  %v143_v17 = vmax.f32 %v131_v14, %v132_v15  ;;  %v137_v18 = vld [vmem:[%s115_s12 + $0x70] sm:$0xff]  ;;  %v138_v19 = vld [vmem:[%s115_s12 + $0x78] sm:$0xff]  ;;  %v135_v20 = vld [vmem:[%s115_s12 + $0x60] sm:$0xff] }
  0x13   : > { %v136_v21 = vld [vmem:[%s115_s12 + $0x68] sm:$0xff]  ;;  %v146_v22 = vmax.f32 %v137_v18, %v138_v19 }
  0x14   : > { %v145_v23 = vmax.f32 %v135_v20, %v136_v21 }
  0x15   : > { %161 = vrot.lane.b32.xlu1 %v142_v10, %s282_s13 }
  0x16   : > { %157 = vrot.lane.b32.xlu0 %v140_v11, %s282_s13 }
  0x19   : > { %165 = vrot.lane.b32.xlu1 %v144_v16, %s282_s13 }
  0x1a   : > { %163 = vrot.lane.b32.xlu0 %v143_v17, %s282_s13 }
  0x1d   : > { %169 = vrot.lane.b32.xlu1 %v146_v22, %s282_s13 }
  0x1e   : > { %167 = vrot.lane.b32.xlu0 %v145_v23, %s282_s13 }
  0x83   : > { %v160_v24 = vpop.permute.xlu1 %159 }
  0x84   : > { %v181_v25 = vmax.f32 %v141_v3, %v160_v24  ;;  %v156_v26 = vpop.permute.xlu0 %155 }
  0x85   : > { %v179_v27 = vmax.f32 %v139_v7, %v156_v26 }
  0x86   : > { %190 = vst.msk [vmem:[%s121_s17 + $0x10] sm:$0xff] %vm187_vm0, %v181_v25 }
  0x87   : > { %188 = vst.msk [vmem:[%s121_s17] sm:$0xff] %vm187_vm0, %v179_v27  ;;  %v162_v28 = vpop.permute.xlu1 %161 }
  0x88   : > { %v182_v29 = vmax.f32 %v142_v10, %v162_v28  ;;  %v158_v30 = vpop.permute.xlu0 %157 }
  0x89   : > { %v180_v31 = vmax.f32 %v140_v11, %v158_v30 }
  0x8a   : > { %191 = vst.msk [vmem:[%s121_s17 + $0x18] sm:$0xff] %vm187_vm0, %v182_v29 }
  0x8b   : > { %189 = vst.msk [vmem:[%s121_s17 + $0x8] sm:$0xff] %vm187_vm0, %v180_v31  ;;  %v166_v32 = vpop.permute.xlu1 %165 }
  0x8c   : > { %v184_v33 = vmax.f32 %v144_v16, %v166_v32  ;;  %v164_v34 = vpop.permute.xlu0 %163 }
  0x8d   : > { %v183_v35 = vmax.f32 %v143_v17, %v164_v34 }
  0x8e   : > { %193 = vst.msk [vmem:[%s121_s17 + $0x28] sm:$0xff] %vm187_vm0, %v184_v33 }
  0x8f   : > { %192 = vst.msk [vmem:[%s121_s17 + $0x20] sm:$0xff] %vm187_vm0, %v183_v35  ;;  %v170_v36 = vpop.permute.xlu1 %169 }
  0x90   : > { %v186_v37 = vmax.f32 %v146_v22, %v170_v36  ;;  %v168_v38 = vpop.permute.xlu0 %167 }
  0x91   : > { %v185_v39 = vmax.f32 %v145_v23, %v168_v38 }
  0x92   : > { %195 = vst.msk [vmem:[%s121_s17 + $0x38] sm:$0xff] %vm187_vm0, %v186_v37 }
  0x93   : > { %194 = vst.msk [vmem:[%s121_s17 + $0x30] sm:$0xff] %vm187_vm0, %v185_v39 }
  0x94 PF: > { %s11_s6 = sadd.s32 1, %s280_s6  }
  0x95   : > { %p8_p4 = scmp.ge.s32.totalorder %s11_s6, 4  }
  0x97   :  { %10 = sbr.rel (!%p8_p4) target bundleno = 1 (0x1), region = 54 }

</bundles_post_ra>
